<compile_context>
chip_gen: v5e
topology: v5e:2x2
jax: 0.10.0
libtpu: 0.0.40
codegen_flags: <defaults>
</compile_context>

<pallas_src>
import functools

import jax
import jax.numpy as jnp
from jax.experimental import pallas as pl
from jax.experimental.pallas import tpu as pltpu

_LANE = 128
_SUBLANE = 8


def _round_up(n, m):
    return ((n + m - 1) // m) * m


def _vmem_budget_bytes():
    """Generation-aware scoped-VMEM budget (leave headroom for compiler scratch)."""
    try:
        cap = int(pltpu.get_tpu_info().vmem_capacity_bytes)
    except Exception:
        cap = 64 * 1024 * 1024  # conservative fallback: v7x per-TC capacity
    return int(cap * 0.8)       # ~102 MiB on v5e/v6e (128 MiB), ~51 MiB on v7x (64 MiB)


def _has_bf16_vector_units():
    """v6e / v7x have bf16 VPU+EUP; v5e and earlier do not."""
    try:
        kind = jax.devices()[0].device_kind.lower()
    except Exception:
        return False
    return not any(v in kind for v in ("v2", "v3", "v4", "v5"))


def autoencoder_kernel(x_ref, w_enc_ref, b_enc_ref, w_dec_ref, b_dec_ref,
                       enc_ref, dec_ref, *, compute_dtype, bf16_second_tanh):
    # encoder: Linear(input_size, output_size) -> Tanh
    x = x_ref[...].astype(compute_dtype)            # in-kernel cast (cheap VPU work)
    h = jnp.dot(x, w_enc_ref[...], preferred_element_type=jnp.float32)
    h = h + b_enc_ref[...]                          # f32 (1, O_pad) broadcast
    encoded = jnp.tanh(h)                           # f32
    enc_ref[...] = encoded.astype(enc_ref.dtype)

    # decoder: Tanh -> Linear(output_size, input_size)
    if bf16_second_tanh:
        t = jnp.tanh(encoded.astype(compute_dtype))     # bf16 EUP path (v6e / v7x)
    else:
        t = jnp.tanh(encoded).astype(compute_dtype)     # f32 EUP path (v5e and earlier)
    d = jnp.dot(t, w_dec_ref[...], preferred_element_type=jnp.float32)
    d = d + b_dec_ref[...]                          # f32 (1, I_pad) broadcast
    dec_ref[...] = d.astype(dec_ref.dtype)


def prepare_params(w_enc, b_enc, w_dec, b_dec, compute_dtype=jnp.bfloat16):
    """Pad feature dims to lane multiples and cast weights ONCE (hoisted out of forward).

    w_enc: (input_size, output_size), w_dec: (output_size, input_size) — pre-transposed
    (in_features, out_features) layouts; biases any shape broadcastable to (1, out).
    """
    I, O = w_enc.shape
    I_pad = _round_up(I, _LANE)
    O_pad = _round_up(O, _LANE)
    b_enc = jnp.reshape(b_enc, (1, O))
    b_dec = jnp.reshape(b_dec, (1, I))
    wep = jnp.zeros((I_pad, O_pad), compute_dtype).at[:I, :O].set(w_enc.astype(compute_dtype))
    bep = jnp.zeros((1, O_pad), jnp.float32).at[:, :O].set(b_enc.astype(jnp.float32))
    wdp = jnp.zeros((O_pad, I_pad), compute_dtype).at[:O, :I].set(w_dec.astype(compute_dtype))
    bdp = jnp.zeros((1, I_pad), jnp.float32).at[:, :I].set(b_dec.astype(jnp.float32))
    return dict(w_enc=wep, b_enc=bep, w_dec=wdp, b_dec=bdp,
                input_size=I, output_size=O, compute_dtype=compute_dtype)


def autoencoder_forward(x, params, *, target_tb=1024,
                        encoded_dtype=jnp.bfloat16, decoded_dtype=jnp.float32):
    """x: (B, input_size) f32. Returns (encoded (B, output_size), decoded (B, input_size))."""
    wep, bep, wdp, bdp = params["w_enc"], params["b_enc"], params["w_dec"], params["b_dec"]
    I, O = params["input_size"], params["output_size"]
    cdt = params["compute_dtype"]

    B = x.shape[0]
    assert x.shape[1] == I
    I_pad, O_pad = wep.shape

    budget = _vmem_budget_bytes()
    w_itemsize = jnp.dtype(cdt).itemsize
    enc_itemsize = jnp.dtype(encoded_dtype).itemsize
    dec_itemsize = jnp.dtype(decoded_dtype).itemsize

    # Resident (single-buffered) weights + biases.
    resident_1buf = (wep.size + wdp.size) * w_itemsize + (bep.size + bdp.size) * 4

    # Largest sublane-aligned batch tile that keeps >= 2 grid steps (when B allows,
    # so both v7x TensorCores get work) and fits the VMEM budget.
    B8 = _round_up(B, _SUBLANE)
    if B8 >= 2 * _SUBLANE:
        tb = min(target_tb, _round_up(pl.cdiv(B8, 2), _SUBLANE))
    else:
        tb = B8
    tb = max(_SUBLANE, _round_up(tb, _SUBLANE))

    def _tile_bytes(t):
        io = t * (I_pad * 4 + O_pad * enc_itemsize + I_pad * dec_itemsize)  # x / enc / dec tiles
        interm = t * (2 * O_pad + I_pad) * 4                                # f32 h/encoded/d live vals
        return 2 * io + interm                                              # activations double-buffered

    while tb > _SUBLANE and resident_1buf + _tile_bytes(tb) > budget:
        tb = max(_SUBLANE, _round_up(tb // 2, _SUBLANE))
    # TODO(synk): if padded weights alone ever exceed the budget (huge I/O on v7x's 64 MiB
    # VMEM), add a K-tiled fallback (contraction grid axis marked 'arbitrary', f32
    # accumulator scratch with pl.when init/finalize) instead of fully resident weights.

    B_pad = _round_up(B8, tb)
    n_tiles = B_pad // tb

    # Only materialize a padded copy of x when padding is actually required; otherwise
    # pass x (f32) straight into pallas_call and cast inside the kernel.
    if I != I_pad or B != B_pad:
        xk = jnp.zeros((B_pad, I_pad), cdt).at[:B, :I].set(x.astype(cdt))
    else:
        xk = x

    kernel = functools.partial(
        autoencoder_kernel,
        compute_dtype=cdt,
        bf16_second_tanh=(cdt == jnp.bfloat16 and _has_bf16_vector_units()),
    )

    out_shape = (
        jax.ShapeDtypeStruct((B_pad, O_pad), encoded_dtype),
        jax.ShapeDtypeStruct((B_pad, I_pad), decoded_dtype),
    )
    out_specs = (
        pl.BlockSpec((tb, O_pad), lambda i: (i, 0)),   # encoded tile (lane-dense)
        pl.BlockSpec((tb, I_pad), lambda i: (i, 0)),   # decoded tile (lane-dense)
    )

    # Scheduler hints.
    flops = 2 * B_pad * I_pad * O_pad * 2              # two matmuls
    transcendentals = 2 * B_pad * O_pad                # two tanh passes over (B, O)
    bytes_accessed = (xk.size * jnp.dtype(xk.dtype).itemsize
                      + (wep.size + wdp.size) * w_itemsize
                      + (bep.size + bdp.size) * 4
                      + B_pad * O_pad * enc_itemsize
                      + B_pad * I_pad * dec_itemsize)
    cost = pl.CostEstimate(flops=flops, transcendentals=transcendentals,
                           bytes_accessed=bytes_accessed)

    def _build(single_buffer_weights):
        if single_buffer_weights and hasattr(pl, "Buffered"):
            def const_spec(shape):
                # Constant index_map -> no prefetch needed; single buffer halves resident VMEM.
                return pl.BlockSpec(shape, lambda i: (0, 0), pipeline_mode=pl.Buffered(1))
        else:
            def const_spec(shape):
                return pl.BlockSpec(shape, lambda i: (0, 0))
        in_specs = [
            pl.BlockSpec((tb, I_pad), lambda i: (i, 0)),   # x tile (pipelined)
            const_spec((I_pad, O_pad)),                    # w_enc (VMEM-resident)
            const_spec((1, O_pad)),                        # b_enc
            const_spec((O_pad, I_pad)),                    # w_dec (VMEM-resident)
            const_spec((1, I_pad)),                        # b_dec
        ]
        return pl.pallas_call(
            kernel,
            out_shape=out_shape,
            grid_spec=pltpu.PrefetchScalarGridSpec(
                num_scalar_prefetch=0,
                grid=(n_tiles,),
                in_specs=in_specs,
                out_specs=out_specs,
            ),
            compiler_params=pltpu.CompilerParams(
                dimension_semantics=("parallel",),
                vmem_limit_bytes=budget,
            ),
            cost_estimate=cost,
        )

    try:
        enc_p, dec_p = _build(single_buffer_weights=True)(xk, wep, bep, wdp, bdp)
    except Exception:
        # pipeline_mode=Buffered(1) unsupported on this build -> default double buffering.
        enc_p, dec_p = _build(single_buffer_weights=False)(xk, wep, bep, wdp, bdp)

    # Skip the un-pad slice (an extra HBM copy) when no padding was added.
    enc = enc_p if (B == B_pad and O == O_pad) else enc_p[:B, :O]
    dec = dec_p if (B == B_pad and I == I_pad) else dec_p[:B, :I]
    return enc, dec


def init_params(key, input_size, output_size):
    """Deterministic init matching nn.Linear's uniform(-1/sqrt(fan_in), 1/sqrt(fan_in))."""
    k1, k2, k3, k4 = jax.random.split(key, 4)
    bound_enc = 1.0 / jnp.sqrt(jnp.float32(input_size))
    bound_dec = 1.0 / jnp.sqrt(jnp.float32(output_size))
    # stored pre-transposed: (in_features, out_features)
    w_enc = jax.random.uniform(k1, (input_size, output_size), jnp.float32,
                               -bound_enc, bound_enc)
    b_enc = jax.random.uniform(k2, (1, output_size), jnp.float32,
                               -bound_enc, bound_enc)
    w_dec = jax.random.uniform(k3, (output_size, input_size), jnp.float32,
                               -bound_dec, bound_dec)
    b_dec = jax.random.uniform(k4, (1, input_size), jnp.float32,
                               -bound_dec, bound_dec)
    return w_enc, b_enc, w_dec, b_dec


if __name__ == "__main__":
    input_size = 48
    output_size = 16
    batch = 64

    key = jax.random.PRNGKey(0)
    kx, kp = jax.random.split(key)
    x = jax.random.normal(kx, (batch, input_size), jnp.float32)
    w_enc, b_enc, w_dec, b_dec = init_params(kp, input_size, output_size)

    params = prepare_params(w_enc, b_enc, w_dec, b_dec)   # pad + bf16-cast once
    encoded, decoded = autoencoder_forward(x, params)
    jax.block_until_ready((encoded, decoded))

    # Reference in plain JAX, using bf16-rounded operands / f32 accumulation like the kernel
    # (PyTorch semantics: encoded = tanh(x @ W1 + b1); decoded = tanh(encoded) @ W2 + b2).
    bf = lambda a: a.astype(jnp.bfloat16).astype(jnp.float32)
    enc_ref = jnp.tanh(bf(x) @ bf(w_enc) + b_enc)
    dec_ref = bf(jnp.tanh(enc_ref)) @ bf(w_dec) + b_dec

    assert encoded.shape == (batch, output_size) and decoded.shape == (batch, input_size)
    assert jnp.allclose(encoded.astype(jnp.float32), enc_ref, atol=2e-2, rtol=2e-2), \
        "encoded mismatch"
    assert jnp.allclose(decoded.astype(jnp.float32), dec_ref, atol=2e-2, rtol=2e-2), \
        "decoded mismatch"

    print("KERNEL_OK")
</pallas_src>

<mosaic_0001>
module attributes {stable_mosaic.version = 11 : i64} {
  func.func @autoencoder_kernel(%arg0: i32, %arg1: memref<32x128xbf16, #tpu.memory_space<vmem>>, %arg2: memref<128x128xbf16, #tpu.memory_space<vmem>>, %arg3: memref<1x128xf32, #tpu.memory_space<vmem>>, %arg4: memref<128x128xbf16, #tpu.memory_space<vmem>>, %arg5: memref<1x128xf32, #tpu.memory_space<vmem>>, %arg6: memref<32x128xbf16, #tpu.memory_space<vmem>>, %arg7: memref<32x128xf32, #tpu.memory_space<vmem>>) attributes {dimension_semantics = [#tpu.dimension_semantics<parallel>], iteration_bounds = array<i64: 2>, scalar_prefetch = 0 : i64, scratch_operands = 0 : i64, tpu.core_type = #tpu.core_type<tc>, window_params = [{transform_indices = @transform_0, window_bounds = array<i64: 32, 128>}, {pipeline_mode = #tpu.pipeline_mode<synchronous>, transform_indices = @transform_1, window_bounds = array<i64: 128, 128>}, {pipeline_mode = #tpu.pipeline_mode<synchronous>, transform_indices = @transform_2, window_bounds = array<i64: 1, 128>}, {pipeline_mode = #tpu.pipeline_mode<synchronous>, transform_indices = @transform_3, window_bounds = array<i64: 128, 128>}, {pipeline_mode = #tpu.pipeline_mode<synchronous>, transform_indices = @transform_4, window_bounds = array<i64: 1, 128>}, {transform_indices = @transform_5, window_bounds = array<i64: 32, 128>}, {transform_indices = @transform_6, window_bounds = array<i64: 32, 128>}]} {
    %c0 = arith.constant 0 : index
    %c0_0 = arith.constant 0 : index
    %0 = vector.load %arg1[%c0, %c0_0] : memref<32x128xbf16, #tpu.memory_space<vmem>>, vector<32x128xbf16>
    %c0_1 = arith.constant 0 : index
    %c0_2 = arith.constant 0 : index
    %1 = vector.load %arg2[%c0_1, %c0_2] : memref<128x128xbf16, #tpu.memory_space<vmem>>, vector<128x128xbf16>
    %cst = arith.constant dense<0.000000e+00> : vector<32x128xf32>
    %2 = tpu.matmul %0, %1, %cst {dimension_numbers = #tpu.dot_dimension_numbers<[1], [0], [0], [1], [0, 0, 1, 1], [], []>} : vector<32x128xbf16>, vector<128x128xbf16>, vector<32x128xf32> -> vector<32x128xf32>
    %c0_3 = arith.constant 0 : index
    %c0_4 = arith.constant 0 : index
    %3 = vector.load %arg3[%c0_3, %c0_4] : memref<1x128xf32, #tpu.memory_space<vmem>>, vector<1x128xf32>
    %4 = vector.broadcast %3 : vector<1x128xf32> to vector<32x128xf32>
    %5 = arith.addf %2, %4 : vector<32x128xf32>
    %6 = math.tanh %5 : vector<32x128xf32>
    %7 = arith.truncf %6 : vector<32x128xf32> to vector<32x128xbf16>
    %c0_5 = arith.constant 0 : index
    %c0_6 = arith.constant 0 : index
    %8 = vector.load %arg6[%c0_5, %c0_6] : memref<32x128xbf16, #tpu.memory_space<vmem>>, vector<32x128xbf16>
    tpu.vector_store %arg6[%c0_5, %c0_6], %7 {strides = array<i32>} : memref<32x128xbf16, #tpu.memory_space<vmem>>, vector<32x128xbf16>,
    %9 = arith.truncf %6 : vector<32x128xf32> to vector<32x128xbf16>
    %10 = math.tanh %9 : vector<32x128xbf16>
    %c0_7 = arith.constant 0 : index
    %c0_8 = arith.constant 0 : index
    %11 = vector.load %arg4[%c0_7, %c0_8] : memref<128x128xbf16, #tpu.memory_space<vmem>>, vector<128x128xbf16>
    %cst_9 = arith.constant dense<0.000000e+00> : vector<32x128xf32>
    %12 = tpu.matmul %10, %11, %cst_9 {dimension_numbers = #tpu.dot_dimension_numbers<[1], [0], [0], [1], [0, 0, 1, 1], [], []>} : vector<32x128xbf16>, vector<128x128xbf16>, vector<32x128xf32> -> vector<32x128xf32>
    %c0_10 = arith.constant 0 : index
    %c0_11 = arith.constant 0 : index
    %13 = vector.load %arg5[%c0_10, %c0_11] : memref<1x128xf32, #tpu.memory_space<vmem>>, vector<1x128xf32>
    %14 = vector.broadcast %13 : vector<1x128xf32> to vector<32x128xf32>
    %15 = arith.addf %12, %14 : vector<32x128xf32>
    %c0_12 = arith.constant 0 : index
    %c0_13 = arith.constant 0 : index
    %16 = vector.load %arg7[%c0_12, %c0_13] : memref<32x128xf32, #tpu.memory_space<vmem>>, vector<32x128xf32>
    tpu.vector_store %arg7[%c0_12, %c0_13], %15 {strides = array<i32>} : memref<32x128xf32, #tpu.memory_space<vmem>>, vector<32x128xf32>,
    return
  }
  func.func @transform_0(%arg0: i32) -> (i32, i32) {
    %c0_i32 = arith.constant 0 : i32
    %c0_i32_0 = arith.constant 0 : i32
    return %arg0, %c0_i32 : i32, i32
  }
  func.func @transform_1(%arg0: i32) -> (i32, i32) {
    %c0_i32 = arith.constant 0 : i32
    %c0_i32_0 = arith.constant 0 : i32
    %c0_i32_1 = arith.constant 0 : i32
    return %c0_i32, %c0_i32_0 : i32, i32
  }
  func.func @transform_2(%arg0: i32) -> (i32, i32) {
    %c0_i32 = arith.constant 0 : i32
    %c0_i32_0 = arith.constant 0 : i32
    %c0_i32_1 = arith.constant 0 : i32
    return %c0_i32, %c0_i32_0 : i32, i32
  }
  func.func @transform_3(%arg0: i32) -> (i32, i32) {
    %c0_i32 = arith.constant 0 : i32
    %c0_i32_0 = arith.constant 0 : i32
    %c0_i32_1 = arith.constant 0 : i32
    return %c0_i32, %c0_i32_0 : i32, i32
  }
  func.func @transform_4(%arg0: i32) -> (i32, i32) {
    %c0_i32 = arith.constant 0 : i32
    %c0_i32_0 = arith.constant 0 : i32
    %c0_i32_1 = arith.constant 0 : i32
    return %c0_i32, %c0_i32_0 : i32, i32
  }
  func.func @transform_5(%arg0: i32) -> (i32, i32) {
    %c0_i32 = arith.constant 0 : i32
    %c0_i32_0 = arith.constant 0 : i32
    return %arg0, %c0_i32 : i32, i32
  }
  func.func @transform_6(%arg0: i32) -> (i32, i32) {
    %c0_i32 = arith.constant 0 : i32
    %c0_i32_0 = arith.constant 0 : i32
    return %arg0, %c0_i32 : i32, i32
  }
}

module attributes {stable_mosaic.version = 11 : i64} {
  func.func @autoencoder_kernel(%arg0: i32, %arg1: memref<32x128xbf16, #tpu.memory_space<vmem>>, %arg2: memref<128x128xbf16, #tpu.memory_space<vmem>>, %arg3: memref<1x128xf32, #tpu.memory_space<vmem>>, %arg4: memref<128x128xbf16, #tpu.memory_space<vmem>>, %arg5: memref<1x128xf32, #tpu.memory_space<vmem>>, %arg6: memref<32x128xbf16, #tpu.memory_space<vmem>>, %arg7: memref<32x128xf32, #tpu.memory_space<vmem>>) attributes {dimension_semantics = [#tpu.dimension_semantics<parallel>], iteration_bounds = array<i64: 2>, scalar_prefetch = 0 : i64, scratch_operands = 0 : i64, tpu.core_type = #tpu.core_type<tc>, window_params = [{transform_indices = @transform_0, window_bounds = array<i64: 32, 128>}, {pipeline_mode = #tpu.pipeline_mode<synchronous>, transform_indices = @transform_1, window_bounds = array<i64: 128, 128>}, {pipeline_mode = #tpu.pipeline_mode<synchronous>, transform_indices = @transform_2, window_bounds = array<i64: 1, 128>}, {pipeline_mode = #tpu.pipeline_mode<synchronous>, transform_indices = @transform_3, window_bounds = array<i64: 128, 128>}, {pipeline_mode = #tpu.pipeline_mode<synchronous>, transform_indices = @transform_4, window_bounds = array<i64: 1, 128>}, {transform_indices = @transform_5, window_bounds = array<i64: 32, 128>}, {transform_indices = @transform_6, window_bounds = array<i64: 32, 128>}]} {
    %c0 = arith.constant 0 : index
    %c0_0 = arith.constant 0 : index
    %0 = vector.load %arg1[%c0, %c0_0] : memref<32x128xbf16, #tpu.memory_space<vmem>>, vector<32x128xbf16>
    %c0_1 = arith.constant 0 : index
    %c0_2 = arith.constant 0 : index
    %1 = vector.load %arg2[%c0_1, %c0_2] : memref<128x128xbf16, #tpu.memory_space<vmem>>, vector<128x128xbf16>
    %cst = arith.constant dense<0.000000e+00> : vector<32x128xf32>
    %2 = tpu.matmul %0, %1, %cst {dimension_numbers = #tpu.dot_dimension_numbers<[1], [0], [0], [1], [0, 0, 1, 1], [], []>} : vector<32x128xbf16>, vector<128x128xbf16>, vector<32x128xf32> -> vector<32x128xf32>
    %c0_3 = arith.constant 0 : index
    %c0_4 = arith.constant 0 : index
    %3 = vector.load %arg3[%c0_3, %c0_4] : memref<1x128xf32, #tpu.memory_space<vmem>>, vector<1x128xf32>
    %4 = vector.broadcast %3 : vector<1x128xf32> to vector<32x128xf32>
    %5 = arith.addf %2, %4 : vector<32x128xf32>
    %6 = math.tanh %5 : vector<32x128xf32>
    %7 = arith.truncf %6 : vector<32x128xf32> to vector<32x128xbf16>
    %c0_5 = arith.constant 0 : index
    %c0_6 = arith.constant 0 : index
    %8 = vector.load %arg6[%c0_5, %c0_6] : memref<32x128xbf16, #tpu.memory_space<vmem>>, vector<32x128xbf16>
    tpu.vector_store %arg6[%c0_5, %c0_6], %7 {strides = array<i32>} : memref<32x128xbf16, #tpu.memory_space<vmem>>, vector<32x128xbf16>,
    %9 = arith.truncf %6 : vector<32x128xf32> to vector<32x128xbf16>
    %10 = math.tanh %9 : vector<32x128xbf16>
    %c0_7 = arith.constant 0 : index
    %c0_8 = arith.constant 0 : index
    %11 = vector.load %arg4[%c0_7, %c0_8] : memref<128x128xbf16, #tpu.memory_space<vmem>>, vector<128x128xbf16>
    %cst_9 = arith.constant dense<0.000000e+00> : vector<32x128xf32>
    %12 = tpu.matmul %10, %11, %cst_9 {dimension_numbers = #tpu.dot_dimension_numbers<[1], [0], [0], [1], [0, 0, 1, 1], [], []>} : vector<32x128xbf16>, vector<128x128xbf16>, vector<32x128xf32> -> vector<32x128xf32>
    %c0_10 = arith.constant 0 : index
    %c0_11 = arith.constant 0 : index
    %13 = vector.load %arg5[%c0_10, %c0_11] : memref<1x128xf32, #tpu.memory_space<vmem>>, vector<1x128xf32>
    %14 = vector.broadcast %13 : vector<1x128xf32> to vector<32x128xf32>
    %15 = arith.addf %12, %14 : vector<32x128xf32>
    %c0_12 = arith.constant 0 : index
    %c0_13 = arith.constant 0 : index
    %16 = vector.load %arg7[%c0_12, %c0_13] : memref<32x128xf32, #tpu.memory_space<vmem>>, vector<32x128xf32>
    tpu.vector_store %arg7[%c0_12, %c0_13], %15 {strides = array<i32>} : memref<32x128xf32, #tpu.memory_space<vmem>>, vector<32x128xf32>,
    return
  }
  func.func @transform_0(%arg0: i32) -> (i32, i32) {
    %c0_i32 = arith.constant 0 : i32
    %c0_i32_0 = arith.constant 0 : i32
    return %arg0, %c0_i32 : i32, i32
  }
  func.func @transform_1(%arg0: i32) -> (i32, i32) {
    %c0_i32 = arith.constant 0 : i32
    %c0_i32_0 = arith.constant 0 : i32
    %c0_i32_1 = arith.constant 0 : i32
    return %c0_i32, %c0_i32_0 : i32, i32
  }
  func.func @transform_2(%arg0: i32) -> (i32, i32) {
    %c0_i32 = arith.constant 0 : i32
    %c0_i32_0 = arith.constant 0 : i32
    %c0_i32_1 = arith.constant 0 : i32
    return %c0_i32, %c0_i32_0 : i32, i32
  }
  func.func @transform_3(%arg0: i32) -> (i32, i32) {
    %c0_i32 = arith.constant 0 : i32
    %c0_i32_0 = arith.constant 0 : i32
    %c0_i32_1 = arith.constant 0 : i32
    return %c0_i32, %c0_i32_0 : i32, i32
  }
  func.func @transform_4(%arg0: i32) -> (i32, i32) {
    %c0_i32 = arith.constant 0 : i32
    %c0_i32_0 = arith.constant 0 : i32
    %c0_i32_1 = arith.constant 0 : i32
    return %c0_i32, %c0_i32_0 : i32, i32
  }
  func.func @transform_5(%arg0: i32) -> (i32, i32) {
    %c0_i32 = arith.constant 0 : i32
    %c0_i32_0 = arith.constant 0 : i32
    return %arg0, %c0_i32 : i32, i32
  }
  func.func @transform_6(%arg0: i32) -> (i32, i32) {
    %c0_i32 = arith.constant 0 : i32
    %c0_i32_0 = arith.constant 0 : i32
    return %arg0, %c0_i32 : i32, i32
  }
}

</mosaic_0001>

<bundles_post_ra>
// kernel: tpu_custom_call.1
= control target key start
LH: loop header
LB: loop body
LE: loop exit
PB: predicated region body
PF: predicated region fallthrough
CT: control target
= control target key end

     0   :  { %s1349_s0 = inlined_call_operand.hbm [shape: bf16[64,128], index: 0, kind: input, shape index: {}]   ;;  %s1350_s1 = inlined_call_operand.hbm [shape: bf16[128,128], index: 1, kind: input, shape index: {}]   ;;  %s1351_s2 = inlined_call_operand.vmem [shape: f32[1,128], index: 2, kind: input, shape index: {}]   ;;  %s1352_s3 = inlined_call_operand.hbm [shape: bf16[128,128], index: 3, kind: input, shape index: {}]   ;;  %s1353_s4 = inlined_call_operand.vmem [shape: f32[1,128], index: 4, kind: input, shape index: {}]   ;;  %s1354_s5 = inlined_call_operand.hbm [shape: bf16[64,128], index: 5, kind: output, shape index: {0}]   ;;  %s1355_s6 = inlined_call_operand.hbm [shape: f32[64,128], index: 6, kind: output, shape index: {1}]  }
   0x1   :  { %1358 = sst [smem:[#allocation15_spill]] %s1349_s0 }
   0x2   :  { %12 = vsyncpa [#allocation3], 0 }
   0x3   :  { %14 = vsyncpa [#allocation3 + $0x1], 0 }
   0x4   :  { %15 = vsyncpa [#allocation6], 0 }
   0x5   :  { %16 = vsyncpa [#allocation4], 0 }
   0x6   :  { %18 = vsyncpa [#allocation4 + $0x1], 0 }
   0x7   :  { %19 = vsyncpa [#allocation10], 0 }
   0x8   :  { %21 = vsyncpa [#allocation10 + $0x1], 0  ;;  %s1173_s21 = smov 0   ;;  %s1175_s22 = smov 0  }
   0x9   :  { %s1177_s23 = smov 0   ;;  %s1179_s24 = smov 0  }
   0xa LB: > { %s1194_s25 = sadd.s32 4294967295, %s1128_s24   ;;  %s698_s26 = sadd.s32 4294967294, %s1128_s24   ;;  %s1128_s24 = sphi %s1179_s24, %s1371_s24   ;;  %s1124_s23 = sphi %s1177_s23, %s1370_s23   ;;  %s1120_s22 = sphi %s1175_s22, %s1369_s22   ;;  %s1116_s21 = sphi %s1173_s21, %s1368_s21  }
   0xb   : > { %p47_p0 = scmp.ne.s32.totalorder %s1120_s22, %s1116_s21  ;;  %p48_p1 = scmp.eq.s32.totalorder %s1194_s25, 0 }
   0xc   : > { %p155_p2 = scmp.eq.s32.totalorder %s1194_s25, 1  ;;  %p161_p3 = scmp.eq.s32.totalorder %s698_s26, 1 }
   0xd   : > { %p1203_p4 = por %p48_p1, %p47_p0  ;;  %p699_p5 = scmp.ge.s32.totalorder %s1128_s24, 1 }
   0xe   : > { %p1208_p6 = por %p161_p3, %p47_p0  ;;  %p194_p7 = scmp.lt.s32.totalorder %s1128_s24, 3 }
   0xf   : > { %s205_s7 = sshll.u32 %s1350_s1, 4  ;;  %s1130_s9 = smov [#allocation5]   ;;  %s206_s7 = int_to_ptr.hbm [resolvable:$true] %s205_s7 }
  0x10   : > { %p1216_p8 = pnand %p699_p5, %p194_p7  ;;  %s207_s10 = sshll.u32 %s1130_s9, 4  ;;  %s208_s10 = int_to_ptr.vmem [resolvable:$true] %s207_s10 }
  0x11   : > { %s222_s13 = sshll.u32 %s1352_s3, 4  ;;  %s1356_s14 = smov 64   ;;  %s223_s13 = int_to_ptr.hbm [resolvable:$true] %s222_s13 }
  0x12   : > { %p854_p9 = pneg %p1216_p8  ;;  %s1357_s15 = smov 4  }
  0x13   : > { %s1133_s16 = smov [#allocation7]   ;;  %s1235_s18 = sadd.s32 1, %s1128_s24  }
  0x14   : > { %p855_p10 = pnand %p854_p9, %p48_p1  ;;  %s224_s17 = sshll.u32 %s1133_s16, 4  ;;  %s225_s17 = int_to_ptr.vmem [resolvable:$true] %s224_s17 }
  0x15   : > { %s34_s19 = sadd.s32 1, %s1124_s23  ;;  %s31_s20 = ssub.s32 %s1128_s24, %s1235_s18 }
  0x16   : > { %857 = dma.hbm_to_vmem [thread:$0]  (!%p855_p10), %s206_s7, 1024, %s208_s10, [#allocation6], %s1356_s14, %s1356_s14, %s1357_s15  }
  0x17   : > { %860 = dma.hbm_to_vmem [thread:$0]  (!%p855_p10), %s223_s13, 1024, %s225_s17, [#allocation6], %s1356_s14, %s1356_s14, %s1357_s15  }
  0x18   : > { %p41_p12 = scmp.ne.s32.totalorder %s1124_s23, %s1120_s22  ;;  %p32_p13 = scmp.eq.s32.totalorder %s31_s20, 0 }
  0x19   : > { %p42_p0 = scmp.eq.s32.totalorder %s1128_s24, 0  ;;  %p874_p5 = scmp.lt.s32.totalorder %s1128_s24, 2 }
  0x1a   : > { %p1245_p3 = por %p155_p2, %p41_p12  ;;  %s241_s30 = sand.u32 1, %s1124_s23  }
  0x1b   : > { %s1251_s29 = scalar_select %p32_p13, %s1124_s23, %s34_s19  }
  0x1c   : > { %p43_p7 = por %p42_p0, %p41_p12  ;;  %s703_s7 = sshll.u32 %s241_s30, 4 }
  0x1d   : > { %s792_s9 = sshll.u32 %s1128_s24, 4  ;;  %s1363_s0 = sld [smem:[#allocation15_spill]] }
  0x1e   : > { %s245_s13 = scalar_lea.vmem [#allocation2], %s703_s7  ;;  %p1258_p2 = pnand %p874_p5, %p43_p7 }
  0x1f   : > { %s253_s16 = sshll.u32 %s245_s13, 4  ;;  %s242_s19 = scalar_lea.sflag [#allocation3], %s241_s30  ;;  %s254_s16 = int_to_ptr.vmem [resolvable:$true] %s253_s16 }
  0x20   : > { %p1000_p10 = pneg %p1258_p2 }
  0x23   : > { %s250_s12 = scalar_lea.hbm %s1363_s0, %s792_s9  ;;  %s1003_s10 = scalar_lea.hbm %s1363_s0, 32 }
  0x24   : > { %s251_s17 = sshll.u32 %s250_s12, 4  ;;  %s252_s17 = int_to_ptr.hbm [resolvable:$true] %s251_s17 }
  0x25   : > { %s996_s14 = sshra.s32 %s252_s17, 4  ;;  %s997_s14 = int_to_ptr.hbm [resolvable:$true] %s996_s14 }
  0x26   : > { %s998_s15 = scalar_lea.hbm %s997_s14, 16  ;;  %p1004_p0 = scmp.lt.s32.totalorder %s997_s14, %s1363_s0 }
  0x27   : > { %p999_p9 = scmp.ne.s32.totalorder %s997_s14, %s998_s15  ;;  %p1005_p5 = scmp.lt.s32.totalorder %s1003_s10, %s998_s15 }
  0x29   : > { %p1001_p12 = pnand %p1000_p10, %p999_p9  ;;  %p1006_p7 = por %p1005_p5, %p1004_p0 }
  0x2b   : > { %p1002_p13 = pneg %p1001_p12 }
  0x2d   : > { %p1007_p11 = pnand %p1006_p7, %p1002_p13 }
  0x2f   : > { %1010 = shalt.err (!%p1007_p11)
}
  0x30   : > { %s1365_s30 = smov 4   ;;  %s1366_s13 = smov 64  }
  0x31   : > { %864 = dma.hbm_to_vmem [thread:$0]  (!%p1258_p2), %s252_s17, 256, %s254_s16, %s242_s19, %s1366_s13, %s1366_s13, %s1365_s30  }
  0x32   : > { %265 = sbr.rel (%p1216_p8) target bundleno = 398 (0x18e), region = 40  ;;  %s1278_s9 = sand.u32 (!%p1216_p8), 1, %s1120_s22  }
  0x33   : > { %s707_s14 = sshll.u32 (!%p1216_p8), %s1278_s9, 4  ;;  %s268_s15 = scalar_lea.sflag (!%p1216_p8), [#allocation3], %s1278_s9 }
  0x34   : > { %s271_s7 = scalar_lea.vmem (!%p1216_p8), [#allocation2], %s707_s14 }
  0x37   : > { %1099 = dma.done.wait (%p1203_p4), %s268_s15, 256  }
  0x38   : > { %1101 = vsyncadd (%p1203_p4), %s268_s15, 4294967040 }
  0x39   : > { %1103 = dma.done.wait (%p48_p1), [#allocation6], 2048  }
  0x3a   : > { %1105 = vsyncadd (%p48_p1), [#allocation6], 4294965248  ;;  %v802_v0 = vld [vmem:[#allocation5 + $0x38] sm:$0xff]  ;;  %v801_v1 = vld [vmem:[#allocation5 + $0x30] sm:$0xff]  ;;  %s308_s16 = scalar_lea.vmem [#allocation8], %s707_s14  ;;  %s811_s17 = sshll.u32 %s1194_s25, 4 }
  0x3b   : > { %403 = vmatpush.bf16.msra.mxu0 %v802_v0  ;;  %824 = vmatpush.bf16.msra.mxu2 %v802_v0  ;;  %v800_v2 = vld [vmem:[#allocation5 + $0x28] sm:$0xff]  ;;  %v799_v3 = vld [vmem:[#allocation5 + $0x20] sm:$0xff]  ;;  %v798_v4 = vld [vmem:[#allocation5 + $0x18] sm:$0xff]  ;;  %s552_s10 = scalar_lea.hbm %s1354_s5, %s811_s17  ;;  %s553_s11 = sshll.u32 %s308_s16, 4  ;;  %s554_s11 = int_to_ptr.vmem [resolvable:$true] %s553_s11 }
  0x3c   : > { %v797_v5 = vld [vmem:[#allocation5 + $0x10] sm:$0xff]  ;;  %v796_v6 = vld [vmem:[#allocation5 + $0x8] sm:$0xff]  ;;  %v795_v7 = vld [vmem:[#allocation5] sm:$0xff]  ;;  %s555_s12 = sshll.u32 %s552_s10, 4  ;;  %s536_s30 = scalar_lea.sflag [#allocation4], %s1278_s9  ;;  %s556_s12 = int_to_ptr.hbm [resolvable:$true] %s555_s12 }
  0x3d   : > { %v793_v8 = vld [vmem:[%s271_s7] sm:$0xff]  ;;  %v794_v9 = vld [vmem:[%s271_s7 + $0x8] sm:$0xff]  ;;  %s1040_s13 = sshra.s32 %s556_s12, 4  ;;  %s1046_s27 = scalar_lea.hbm %s1354_s5, 32  ;;  %s1041_s13 = int_to_ptr.hbm [resolvable:$true] %s1040_s13 }
  0x3e   : > { %v810_v10 = vld [vmem:[#allocation7 + $0x38] sm:$0xff]  ;;  %v809_v11 = vld [vmem:[#allocation7 + $0x30] sm:$0xff]  ;;  %v808_v12 = vld [vmem:[#allocation7 + $0x28] sm:$0xff]  ;;  %s1042_s14 = scalar_lea.hbm %s1041_s13, 16  ;;  %p1047_p11 = scmp.lt.s32.totalorder %s1041_s13, %s1354_s5 }
  0x3f   : > { %404 = vmatpush.bf16.msra.mxu0 %v801_v1  ;;  %825 = vmatpush.bf16.msra.mxu2 %v801_v1  ;;  %v807_v13 = vld [vmem:[#allocation7 + $0x20] sm:$0xff]  ;;  %v806_v14 = vld [vmem:[#allocation7 + $0x18] sm:$0xff]  ;;  %v805_v15 = vld [vmem:[#allocation7 + $0x10] sm:$0xff]  ;;  %p1043_p1 = scmp.ne.s32.totalorder %s1041_s13, %s1042_s14  ;;  %p1048_p2 = scmp.lt.s32.totalorder %s1046_s27, %s1042_s14 }
  0x40   : > { %512 = vmatpush.bf16.msra.mxu1 %v810_v10  ;;  %832 = vmatpush.bf16.msra.mxu3 %v810_v10  ;;  %v804_v16 = vld [vmem:[#allocation7 + $0x8] sm:$0xff]  ;;  %v803_v17 = vld [vmem:[#allocation7] sm:$0xff] }
  0x41   : > { %v918_v18 = vld [vmem:[%s1351_s2] ss:$0 sm:$0xff]  ;;  %p1044_p4 = pnand %p1043_p1, %p1245_p3  ;;  %p1049_p9 = por %p1048_p2, %p1047_p11 }
  0x43   : > { %405 = vmatpush.bf16.msra.mxu0 %v800_v2  ;;  %826 = vmatpush.bf16.msra.mxu2 %v800_v2  ;;  %p1045_p8 = pneg %p1044_p4 }
  0x44   : > { %513 = vmatpush.bf16.msra.mxu1 %v809_v11  ;;  %833 = vmatpush.bf16.msra.mxu3 %v809_v11 }
  0x45   : > { %p1050_p10 = pnand %p1049_p9, %p1045_p8 }
  0x47   : > { %406 = vmatpush.bf16.msra.mxu0 %v799_v3  ;;  %827 = vmatpush.bf16.msra.mxu2 %v799_v3 }
  0x48   : > { %514 = vmatpush.bf16.msra.mxu1 %v808_v12  ;;  %834 = vmatpush.bf16.msra.mxu3 %v808_v12 }
  0x4b   : > { %407 = vmatpush.bf16.msra.mxu0 %v798_v4  ;;  %828 = vmatpush.bf16.msra.mxu2 %v798_v4 }
  0x4c   : > { %515 = vmatpush.bf16.msra.mxu1 %v807_v13  ;;  %835 = vmatpush.bf16.msra.mxu3 %v807_v13 }
  0x4f   : > { %408 = vmatpush.bf16.msra.mxu0 %v797_v5  ;;  %829 = vmatpush.bf16.msra.mxu2 %v797_v5 }
  0x50   : > { %516 = vmatpush.bf16.msra.mxu1 %v806_v14  ;;  %836 = vmatpush.bf16.msra.mxu3 %v806_v14 }
  0x53   : > { %409 = vmatpush.bf16.msra.mxu0 %v796_v6  ;;  %830 = vmatpush.bf16.msra.mxu2 %v796_v6 }
  0x54   : > { %517 = vmatpush.bf16.msra.mxu1 %v805_v15  ;;  %837 = vmatpush.bf16.msra.mxu3 %v805_v15 }
  0x57   : > { %410 = vmatpush.bf16.msra.mxu0 %v795_v7  ;;  %831 = vmatpush.bf16.msra.mxu2 %v795_v7 }
  0x58   : > { %518 = vmatpush.bf16.msra.mxu1 %v804_v16  ;;  %838 = vmatpush.bf16.msra.mxu3 %v804_v16 }
  0x5a   : > { %411 = vmatmul.bf16.vlgmr.msra.gmra.mxu0 %v793_v8  ;;  %416 = vmatmul.bf16.vlgmr.msra.gmra.mxu2 %v794_v9 }
  0x5c   : > { %519 = vmatpush.bf16.msra.mxu1 %v803_v17  ;;  %839 = vmatpush.bf16.msra.mxu3 %v803_v17 }
  0xd7   : > { %v412_v19 = vpop.f32.mrf.mxu0 }
  0xd8   : > { %v413_v20 = vadd.f32 %v918_v18, %v412_v19 }
  0xda   : > { %920 = vtanh.f32 %v413_v20 }
  0xdd   : > { %v417_v21 = vpop.f32.mrf.mxu2 }
  0xde   : > { %v418_v22 = vadd.f32 %v918_v18, %v417_v21 }
  0xdf   : > { %v414_v23 = vpop.f32.mrf.mxu0 }
  0xe0   : > { %v921_v24 = vpop.eup %920  ;;  %v415_v25 = vadd.f32 %v918_v18, %v414_v23  ;;  %922 = vtanh.f32 %v418_v22 }
  0xe1   : > { %v426_v26 = vpack.c.bf16 %v921_v24, %v921_v24 }
  0xe2   : > { %924 = vtanh.f32 %v415_v25 }
  0xe3   : > { %v434_v30 = vunpack.c.l.bf16 %v426_v26 }
  0xe5   : > { %v419_v27 = vpop.f32.mrf.mxu2 }
  0xe6   : > { %v420_v28 = vadd.f32 %v918_v18, %v419_v27  ;;  %v923_v29 = vpop.eup %922 }
  0xe7   : > { %v428_v34 = vpack.c.bf16 %v923_v29, %v923_v29 }
  0xe8   : > { %v925_v31 = vpop.eup %924  ;;  %926 = vtanh.f32 %v420_v28 }
  0xe9   : > { %v427_v32 = vpack.c.bf16 %v925_v31, %v925_v31  ;;  %v816_v33 = vpack.c.bf16 %v925_v31, %v921_v24  ;;  %928 = vtanh.f32 %v434_v30  ;;  %v436_v37 = vunpack.c.l.bf16 %v428_v34 }
  0xeb   : > { %817 = vst [vmem:[%s308_s16] sm:$0xff] %v816_v33   ;;  %v435_v35 = vunpack.c.l.bf16 %v427_v32 }
  0xed   : > { %930 = vtanh.f32 %v435_v35 }
  0xee   : > { %v927_v36 = vpop.eup %926  ;;  %932 = vtanh.f32 %v436_v37 }
  0xef   : > { %v429_v38 = vpack.c.bf16 %v927_v36, %v927_v36  ;;  %v821_v39 = vpack.c.bf16 %v927_v36, %v923_v29  ;;  %v929_v40 = vpop.eup %928 }
  0xf1   : > { %823 = vst [vmem:[%s308_s16 + $0x8] sm:$0xff] %v821_v39   ;;  %v437_v41 = vunpack.c.l.bf16 %v429_v38 }
  0xf3   : > { %v931_v42 = vpop.eup %930  ;;  %934 = vtanh.f32 %v437_v41 }
  0xf4   : > { %v442_v43 = vpack.c.bf16 %v931_v42, %v929_v40  ;;  %v933_v44 = vpop.eup %932 }
  0xf6   : > { %520 = vmatmul.bf16.vlgmr.msra.gmra.mxu1 %v442_v43 }
  0xf9   : > { %v935_v45 = vpop.eup %934 }
  0xfa   : > { %v443_v46 = vpack.c.bf16 %v935_v45, %v933_v44 }
  0xfc   : > { %525 = vmatmul.bf16.vlgmr.msra.gmra.mxu3 %v443_v46 }
  0xfd   : > { %1053 = shalt.err (!%p1050_p10)
}
  0xfe   : > { %s1134_s16 = smov 64   ;;  %s1135_s17 = smov 4   ;;  %v919_v47 = vld [vmem:[%s1353_s4] ss:$0 sm:$0xff] }
  0xff   : > { %850 = dma.vmem_to_hbm [thread:$0]  (%p1245_p3), %s554_s11, 256, %s556_s12, %s536_s30, %s1134_s16, %s1134_s16, %s1135_s17  }
 0x100   : > { %s711_s20 = sshll.u32 %s1278_s9, 5  ;;  %s812_s13 = sshll.u32 %s1194_s25, 5 }
 0x101   : > { %s315_s0 = scalar_lea.vmem [#allocation9], %s711_s20  ;;  %s569_s12 = scalar_lea.hbm %s1355_s6, %s812_s13 }
 0x102   : > { %s570_s30 = sshll.u32 %s315_s0, 4  ;;  %s572_s15 = sshll.u32 %s569_s12, 4  ;;  %s571_s30 = int_to_ptr.vmem [resolvable:$true] %s570_s30  ;;  %s573_s15 = int_to_ptr.hbm [resolvable:$true] %s572_s15 }
 0x103   : > { %s541_s7 = scalar_lea.sflag [#allocation10], %s1278_s9  ;;  %s1068_s27 = sshra.s32 %s573_s15, 4  ;;  %s1069_s27 = int_to_ptr.hbm [resolvable:$true] %s1068_s27 }
 0x104   : > { %s1070_s8 = scalar_lea.hbm %s1069_s27, 32  ;;  %s1074_s17 = scalar_lea.hbm %s1355_s6, 64 }
 0x105   : > { %p1071_p12 = scmp.ne.s32.totalorder %s1069_s27, %s1070_s8  ;;  %p1075_p5 = scmp.lt.s32.totalorder %s1069_s27, %s1355_s6 }
 0x106   : > { %p1076_p7 = scmp.lt.s32.totalorder %s1074_s17, %s1070_s8 }
 0x107   : > { %p1072_p13 = pnand %p1071_p12, %p1245_p3 }
 0x108   : > { %p1077_p1 = por %p1076_p7, %p1075_p5 }
 0x109   : > { %p1073_p0 = pneg %p1072_p13 }
 0x10b   : > { %p1078_p4 = pnand %p1077_p1, %p1073_p0 }
 0x173   : > { %v521_v48 = vpop.f32.mrf.mxu1 }
 0x174   : > { %v522_v49 = vadd.f32 %v919_v47, %v521_v48 }
 0x176   : > { %531 = vst [vmem:[%s315_s0] sm:$0xff] %v522_v49 }
 0x17b   : > { %v523_v50 = vpop.f32.mrf.mxu1 }
 0x17c   : > { %v524_v51 = vadd.f32 %v919_v47, %v523_v50 }
 0x17e   : > { %532 = vst [vmem:[%s315_s0 + $0x8] sm:$0xff] %v524_v51 }
 0x17f   : > { %v526_v52 = vpop.f32.mrf.mxu3 }
 0x180   : > { %v527_v53 = vadd.f32 %v919_v47, %v526_v52 }
 0x182   : > { %533 = vst [vmem:[%s315_s0 + $0x10] sm:$0xff] %v527_v53 }
 0x187   : > { %v528_v54 = vpop.f32.mrf.mxu3 }
 0x188   : > { %v529_v55 = vadd.f32 %v919_v47, %v528_v54 }
 0x18a   : > { %534 = vst [vmem:[%s315_s0 + $0x18] sm:$0xff] %v529_v55 }
 0x18b   : > { %1081 = shalt.err (!%p1078_p4)
}
 0x18c   : > { %s1136_s9 = smov 128   ;;  %s1137_s10 = smov 8  }
 0x18d   : > { %851 = dma.vmem_to_hbm [thread:$0]  (%p1245_p3), %s571_s30, 512, %s573_s15, %s541_s7, %s1136_s9, %s1136_s9, %s1137_s10  }
 0x18e PF: > { %s587_s0 = sand.u32 1, %s1116_s21   ;;  %p1367_p8 = scmp.ge.s32.totalorder %s1128_s24, 2 }
 0x18f   : > { %s588_s13 = scalar_lea.sflag [#allocation4], %s587_s0 }
 0x190   : > { %p866_p11 = pnand %p1367_p8, %p1208_p6 }
 0x192   : > { %p867_p2 = pneg %p866_p11 }
 0x194   : > { %1107 = dma.done.wait (%p867_p2), %s588_s13, 256  }
 0x195   : > { %1109 = vsyncadd (%p867_p2), %s588_s13, 4294967040  ;;  %s598_s14 = scalar_lea.sflag [#allocation10], %s587_s0 }
 0x196   : > { %1111 = dma.done.wait (%p867_p2), %s598_s14, 512  }
 0x197   : > { %1113 = vsyncadd (%p867_p2), %s598_s14, 4294966784  ;;  %p24_p3 = scmp.ge.s32.totalorder %s1235_s18, 4   ;;  %s1368_s21 = smov %s1120_s22 }
 0x198   : > { %s1369_s22 = smov %s1124_s23  ;;  %s1370_s23 = smov %s1251_s29 }
 0x199   : > { %s1371_s24 = smov %s1235_s18  ;;  %26 = sbr.rel (!%p24_p3) target bundleno = 10 (0xa), region = 110 }
 0x19e   :  { %604 = vsyncpa [#allocation3], 1 }
 0x19f   :  { %606 = vsyncpa [#allocation3 + $0x1], 1 }
 0x1a0   :  { %607 = vsyncpa [#allocation6], 1 }
 0x1a1   :  { %608 = vsyncpa [#allocation4], 1 }
 0x1a2   :  { %610 = vsyncpa [#allocation4 + $0x1], 1 }
 0x1a3   :  { %611 = vsyncpa [#allocation10], 1 }
 0x1a4   :  { %613 = vsyncpa [#allocation10 + $0x1], 1 }

// kernel: tpu_custom_call.1
= control target key start
LH: loop header
LB: loop body
LE: loop exit
PB: predicated region body
PF: predicated region fallthrough
CT: control target
= control target key end

     0   :  { %s1349_s0 = inlined_call_operand.hbm [shape: bf16[64,128], index: 0, kind: input, shape index: {}]   ;;  %s1350_s1 = inlined_call_operand.hbm [shape: bf16[128,128], index: 1, kind: input, shape index: {}]   ;;  %s1351_s2 = inlined_call_operand.vmem [shape: f32[1,128], index: 2, kind: input, shape index: {}]   ;;  %s1352_s3 = inlined_call_operand.hbm [shape: bf16[128,128], index: 3, kind: input, shape index: {}]   ;;  %s1353_s4 = inlined_call_operand.vmem [shape: f32[1,128], index: 4, kind: input, shape index: {}]   ;;  %s1354_s5 = inlined_call_operand.hbm [shape: bf16[64,128], index: 5, kind: output, shape index: {0}]   ;;  %s1355_s6 = inlined_call_operand.hbm [shape: f32[64,128], index: 6, kind: output, shape index: {1}]  }
   0x1   :  { %1358 = sst [smem:[#allocation15_spill]] %s1349_s0 }
   0x2   :  { %12 = vsyncpa [#allocation3], 0 }
   0x3   :  { %14 = vsyncpa [#allocation3 + $0x1], 0 }
   0x4   :  { %15 = vsyncpa [#allocation6], 0 }
   0x5   :  { %16 = vsyncpa [#allocation4], 0 }
   0x6   :  { %18 = vsyncpa [#allocation4 + $0x1], 0 }
   0x7   :  { %19 = vsyncpa [#allocation10], 0 }
   0x8   :  { %21 = vsyncpa [#allocation10 + $0x1], 0  ;;  %s1173_s21 = smov 0   ;;  %s1175_s22 = smov 0  }
   0x9   :  { %s1177_s23 = smov 0   ;;  %s1179_s24 = smov 0  }
   0xa LB: > { %s1194_s25 = sadd.s32 4294967295, %s1128_s24   ;;  %s698_s26 = sadd.s32 4294967294, %s1128_s24   ;;  %s1128_s24 = sphi %s1179_s24, %s1371_s24   ;;  %s1124_s23 = sphi %s1177_s23, %s1370_s23   ;;  %s1120_s22 = sphi %s1175_s22, %s1369_s22   ;;  %s1116_s21 = sphi %s1173_s21, %s1368_s21  }
   0xb   : > { %p47_p0 = scmp.ne.s32.totalorder %s1120_s22, %s1116_s21  ;;  %p48_p1 = scmp.eq.s32.totalorder %s1194_s25, 0 }
   0xc   : > { %p155_p2 = scmp.eq.s32.totalorder %s1194_s25, 1  ;;  %p161_p3 = scmp.eq.s32.totalorder %s698_s26, 1 }
   0xd   : > { %p1203_p4 = por %p48_p1, %p47_p0  ;;  %p699_p5 = scmp.ge.s32.totalorder %s1128_s24, 1 }
   0xe   : > { %p1208_p6 = por %p161_p3, %p47_p0  ;;  %p194_p7 = scmp.lt.s32.totalorder %s1128_s24, 3 }
   0xf   : > { %s205_s7 = sshll.u32 %s1350_s1, 4  ;;  %s1130_s9 = smov [#allocation5]   ;;  %s206_s7 = int_to_ptr.hbm [resolvable:$true] %s205_s7 }
  0x10   : > { %p1216_p8 = pnand %p699_p5, %p194_p7  ;;  %s207_s10 = sshll.u32 %s1130_s9, 4  ;;  %s208_s10 = int_to_ptr.vmem [resolvable:$true] %s207_s10 }
  0x11   : > { %s222_s13 = sshll.u32 %s1352_s3, 4  ;;  %s1356_s14 = smov 64   ;;  %s223_s13 = int_to_ptr.hbm [resolvable:$true] %s222_s13 }
  0x12   : > { %p854_p9 = pneg %p1216_p8  ;;  %s1357_s15 = smov 4  }
  0x13   : > { %s1133_s16 = smov [#allocation7]   ;;  %s1235_s18 = sadd.s32 1, %s1128_s24  }
  0x14   : > { %p855_p10 = pnand %p854_p9, %p48_p1  ;;  %s224_s17 = sshll.u32 %s1133_s16, 4  ;;  %s225_s17 = int_to_ptr.vmem [resolvable:$true] %s224_s17 }
  0x15   : > { %s34_s19 = sadd.s32 1, %s1124_s23  ;;  %s31_s20 = ssub.s32 %s1128_s24, %s1235_s18 }
  0x16   : > { %857 = dma.hbm_to_vmem [thread:$0]  (!%p855_p10), %s206_s7, 1024, %s208_s10, [#allocation6], %s1356_s14, %s1356_s14, %s1357_s15  }
  0x17   : > { %860 = dma.hbm_to_vmem [thread:$0]  (!%p855_p10), %s223_s13, 1024, %s225_s17, [#allocation6], %s1356_s14, %s1356_s14, %s1357_s15  }
  0x18   : > { %p41_p12 = scmp.ne.s32.totalorder %s1124_s23, %s1120_s22  ;;  %p32_p13 = scmp.eq.s32.totalorder %s31_s20, 0 }
  0x19   : > { %p42_p0 = scmp.eq.s32.totalorder %s1128_s24, 0  ;;  %p874_p5 = scmp.lt.s32.totalorder %s1128_s24, 2 }
  0x1a   : > { %p1245_p3 = por %p155_p2, %p41_p12  ;;  %s241_s30 = sand.u32 1, %s1124_s23  }
  0x1b   : > { %s1251_s29 = scalar_select %p32_p13, %s1124_s23, %s34_s19  }
  0x1c   : > { %p43_p7 = por %p42_p0, %p41_p12  ;;  %s703_s7 = sshll.u32 %s241_s30, 4 }
  0x1d   : > { %s792_s9 = sshll.u32 %s1128_s24, 4  ;;  %s1363_s0 = sld [smem:[#allocation15_spill]] }
  0x1e   : > { %s245_s13 = scalar_lea.vmem [#allocation2], %s703_s7  ;;  %p1258_p2 = pnand %p874_p5, %p43_p7 }
  0x1f   : > { %s253_s16 = sshll.u32 %s245_s13, 4  ;;  %s242_s19 = scalar_lea.sflag [#allocation3], %s241_s30  ;;  %s254_s16 = int_to_ptr.vmem [resolvable:$true] %s253_s16 }
  0x20   : > { %p1000_p10 = pneg %p1258_p2 }
  0x23   : > { %s250_s12 = scalar_lea.hbm %s1363_s0, %s792_s9  ;;  %s1003_s10 = scalar_lea.hbm %s1363_s0, 32 }
  0x24   : > { %s251_s17 = sshll.u32 %s250_s12, 4  ;;  %s252_s17 = int_to_ptr.hbm [resolvable:$true] %s251_s17 }
  0x25   : > { %s996_s14 = sshra.s32 %s252_s17, 4  ;;  %s997_s14 = int_to_ptr.hbm [resolvable:$true] %s996_s14 }
  0x26   : > { %s998_s15 = scalar_lea.hbm %s997_s14, 16  ;;  %p1004_p0 = scmp.lt.s32.totalorder %s997_s14, %s1363_s0 }
  0x27   : > { %p999_p9 = scmp.ne.s32.totalorder %s997_s14, %s998_s15  ;;  %p1005_p5 = scmp.lt.s32.totalorder %s1003_s10, %s998_s15 }
  0x29   : > { %p1001_p12 = pnand %p1000_p10, %p999_p9  ;;  %p1006_p7 = por %p1005_p5, %p1004_p0 }
  0x2b   : > { %p1002_p13 = pneg %p1001_p12 }
  0x2d   : > { %p1007_p11 = pnand %p1006_p7, %p1002_p13 }
  0x2f   : > { %1010 = shalt.err (!%p1007_p11)
}
  0x30   : > { %s1365_s30 = smov 4   ;;  %s1366_s13 = smov 64  }
  0x31   : > { %864 = dma.hbm_to_vmem [thread:$0]  (!%p1258_p2), %s252_s17, 256, %s254_s16, %s242_s19, %s1366_s13, %s1366_s13, %s1365_s30  }
  0x32   : > { %265 = sbr.rel (%p1216_p8) target bundleno = 398 (0x18e), region = 40  ;;  %s1278_s9 = sand.u32 (!%p1216_p8), 1, %s1120_s22  }
  0x33   : > { %s707_s14 = sshll.u32 (!%p1216_p8), %s1278_s9, 4  ;;  %s268_s15 = scalar_lea.sflag (!%p1216_p8), [#allocation3], %s1278_s9 }
  0x34   : > { %s271_s7 = scalar_lea.vmem (!%p1216_p8), [#allocation2], %s707_s14 }
  0x37   : > { %1099 = dma.done.wait (%p1203_p4), %s268_s15, 256  }
  0x38   : > { %1101 = vsyncadd (%p1203_p4), %s268_s15, 4294967040 }
  0x39   : > { %1103 = dma.done.wait (%p48_p1), [#allocation6], 2048  }
  0x3a   : > { %1105 = vsyncadd (%p48_p1), [#allocation6], 4294965248  ;;  %v802_v0 = vld [vmem:[#allocation5 + $0x38] sm:$0xff]  ;;  %v801_v1 = vld [vmem:[#allocation5 + $0x30] sm:$0xff]  ;;  %s308_s16 = scalar_lea.vmem [#allocation8], %s707_s14  ;;  %s811_s17 = sshll.u32 %s1194_s25, 4 }
  0x3b   : > { %403 = vmatpush.bf16.msra.mxu0 %v802_v0  ;;  %824 = vmatpush.bf16.msra.mxu2 %v802_v0  ;;  %v800_v2 = vld [vmem:[#allocation5 + $0x28] sm:$0xff]  ;;  %v799_v3 = vld [vmem:[#allocation5 + $0x20] sm:$0xff]  ;;  %v798_v4 = vld [vmem:[#allocation5 + $0x18] sm:$0xff]  ;;  %s552_s10 = scalar_lea.hbm %s1354_s5, %s811_s17  ;;  %s553_s11 = sshll.u32 %s308_s16, 4  ;;  %s554_s11 = int_to_ptr.vmem [resolvable:$true] %s553_s11 }
  0x3c   : > { %v797_v5 = vld [vmem:[#allocation5 + $0x10] sm:$0xff]  ;;  %v796_v6 = vld [vmem:[#allocation5 + $0x8] sm:$0xff]  ;;  %v795_v7 = vld [vmem:[#allocation5] sm:$0xff]  ;;  %s555_s12 = sshll.u32 %s552_s10, 4  ;;  %s536_s30 = scalar_lea.sflag [#allocation4], %s1278_s9  ;;  %s556_s12 = int_to_ptr.hbm [resolvable:$true] %s555_s12 }
  0x3d   : > { %v793_v8 = vld [vmem:[%s271_s7] sm:$0xff]  ;;  %v794_v9 = vld [vmem:[%s271_s7 + $0x8] sm:$0xff]  ;;  %s1040_s13 = sshra.s32 %s556_s12, 4  ;;  %s1046_s27 = scalar_lea.hbm %s1354_s5, 32  ;;  %s1041_s13 = int_to_ptr.hbm [resolvable:$true] %s1040_s13 }
  0x3e   : > { %v810_v10 = vld [vmem:[#allocation7 + $0x38] sm:$0xff]  ;;  %v809_v11 = vld [vmem:[#allocation7 + $0x30] sm:$0xff]  ;;  %v808_v12 = vld [vmem:[#allocation7 + $0x28] sm:$0xff]  ;;  %s1042_s14 = scalar_lea.hbm %s1041_s13, 16  ;;  %p1047_p11 = scmp.lt.s32.totalorder %s1041_s13, %s1354_s5 }
  0x3f   : > { %404 = vmatpush.bf16.msra.mxu0 %v801_v1  ;;  %825 = vmatpush.bf16.msra.mxu2 %v801_v1  ;;  %v807_v13 = vld [vmem:[#allocation7 + $0x20] sm:$0xff]  ;;  %v806_v14 = vld [vmem:[#allocation7 + $0x18] sm:$0xff]  ;;  %v805_v15 = vld [vmem:[#allocation7 + $0x10] sm:$0xff]  ;;  %p1043_p1 = scmp.ne.s32.totalorder %s1041_s13, %s1042_s14  ;;  %p1048_p2 = scmp.lt.s32.totalorder %s1046_s27, %s1042_s14 }
  0x40   : > { %512 = vmatpush.bf16.msra.mxu1 %v810_v10  ;;  %832 = vmatpush.bf16.msra.mxu3 %v810_v10  ;;  %v804_v16 = vld [vmem:[#allocation7 + $0x8] sm:$0xff]  ;;  %v803_v17 = vld [vmem:[#allocation7] sm:$0xff] }
  0x41   : > { %v918_v18 = vld [vmem:[%s1351_s2] ss:$0 sm:$0xff]  ;;  %p1044_p4 = pnand %p1043_p1, %p1245_p3  ;;  %p1049_p9 = por %p1048_p2, %p1047_p11 }
  0x43   : > { %405 = vmatpush.bf16.msra.mxu0 %v800_v2  ;;  %826 = vmatpush.bf16.msra.mxu2 %v800_v2  ;;  %p1045_p8 = pneg %p1044_p4 }
  0x44   : > { %513 = vmatpush.bf16.msra.mxu1 %v809_v11  ;;  %833 = vmatpush.bf16.msra.mxu3 %v809_v11 }
  0x45   : > { %p1050_p10 = pnand %p1049_p9, %p1045_p8 }
  0x47   : > { %406 = vmatpush.bf16.msra.mxu0 %v799_v3  ;;  %827 = vmatpush.bf16.msra.mxu2 %v799_v3 }
  0x48   : > { %514 = vmatpush.bf16.msra.mxu1 %v808_v12  ;;  %834 = vmatpush.bf16.msra.mxu3 %v808_v12 }
  0x4b   : > { %407 = vmatpush.bf16.msra.mxu0 %v798_v4  ;;  %828 = vmatpush.bf16.msra.mxu2 %v798_v4 }
  0x4c   : > { %515 = vmatpush.bf16.msra.mxu1 %v807_v13  ;;  %835 = vmatpush.bf16.msra.mxu3 %v807_v13 }
  0x4f   : > { %408 = vmatpush.bf16.msra.mxu0 %v797_v5  ;;  %829 = vmatpush.bf16.msra.mxu2 %v797_v5 }
  0x50   : > { %516 = vmatpush.bf16.msra.mxu1 %v806_v14  ;;  %836 = vmatpush.bf16.msra.mxu3 %v806_v14 }
  0x53   : > { %409 = vmatpush.bf16.msra.mxu0 %v796_v6  ;;  %830 = vmatpush.bf16.msra.mxu2 %v796_v6 }
  0x54   : > { %517 = vmatpush.bf16.msra.mxu1 %v805_v15  ;;  %837 = vmatpush.bf16.msra.mxu3 %v805_v15 }
  0x57   : > { %410 = vmatpush.bf16.msra.mxu0 %v795_v7  ;;  %831 = vmatpush.bf16.msra.mxu2 %v795_v7 }
  0x58   : > { %518 = vmatpush.bf16.msra.mxu1 %v804_v16  ;;  %838 = vmatpush.bf16.msra.mxu3 %v804_v16 }
  0x5a   : > { %411 = vmatmul.bf16.vlgmr.msra.gmra.mxu0 %v793_v8  ;;  %416 = vmatmul.bf16.vlgmr.msra.gmra.mxu2 %v794_v9 }
  0x5c   : > { %519 = vmatpush.bf16.msra.mxu1 %v803_v17  ;;  %839 = vmatpush.bf16.msra.mxu3 %v803_v17 }
  0xd7   : > { %v412_v19 = vpop.f32.mrf.mxu0 }
  0xd8   : > { %v413_v20 = vadd.f32 %v918_v18, %v412_v19 }
  0xda   : > { %920 = vtanh.f32 %v413_v20 }
  0xdd   : > { %v417_v21 = vpop.f32.mrf.mxu2 }
  0xde   : > { %v418_v22 = vadd.f32 %v918_v18, %v417_v21 }
  0xdf   : > { %v414_v23 = vpop.f32.mrf.mxu0 }
  0xe0   : > { %v921_v24 = vpop.eup %920  ;;  %v415_v25 = vadd.f32 %v918_v18, %v414_v23  ;;  %922 = vtanh.f32 %v418_v22 }
  0xe1   : > { %v426_v26 = vpack.c.bf16 %v921_v24, %v921_v24 }
  0xe2   : > { %924 = vtanh.f32 %v415_v25 }
  0xe3   : > { %v434_v30 = vunpack.c.l.bf16 %v426_v26 }
  0xe5   : > { %v419_v27 = vpop.f32.mrf.mxu2 }
  0xe6   : > { %v420_v28 = vadd.f32 %v918_v18, %v419_v27  ;;  %v923_v29 = vpop.eup %922 }
  0xe7   : > { %v428_v34 = vpack.c.bf16 %v923_v29, %v923_v29 }
  0xe8   : > { %v925_v31 = vpop.eup %924  ;;  %926 = vtanh.f32 %v420_v28 }
  0xe9   : > { %v427_v32 = vpack.c.bf16 %v925_v31, %v925_v31  ;;  %v816_v33 = vpack.c.bf16 %v925_v31, %v921_v24  ;;  %928 = vtanh.f32 %v434_v30  ;;  %v436_v37 = vunpack.c.l.bf16 %v428_v34 }
  0xeb   : > { %817 = vst [vmem:[%s308_s16] sm:$0xff] %v816_v33   ;;  %v435_v35 = vunpack.c.l.bf16 %v427_v32 }
  0xed   : > { %930 = vtanh.f32 %v435_v35 }
  0xee   : > { %v927_v36 = vpop.eup %926  ;;  %932 = vtanh.f32 %v436_v37 }
  0xef   : > { %v429_v38 = vpack.c.bf16 %v927_v36, %v927_v36  ;;  %v821_v39 = vpack.c.bf16 %v927_v36, %v923_v29  ;;  %v929_v40 = vpop.eup %928 }
  0xf1   : > { %823 = vst [vmem:[%s308_s16 + $0x8] sm:$0xff] %v821_v39   ;;  %v437_v41 = vunpack.c.l.bf16 %v429_v38 }
  0xf3   : > { %v931_v42 = vpop.eup %930  ;;  %934 = vtanh.f32 %v437_v41 }
  0xf4   : > { %v442_v43 = vpack.c.bf16 %v931_v42, %v929_v40  ;;  %v933_v44 = vpop.eup %932 }
  0xf6   : > { %520 = vmatmul.bf16.vlgmr.msra.gmra.mxu1 %v442_v43 }
  0xf9   : > { %v935_v45 = vpop.eup %934 }
  0xfa   : > { %v443_v46 = vpack.c.bf16 %v935_v45, %v933_v44 }
  0xfc   : > { %525 = vmatmul.bf16.vlgmr.msra.gmra.mxu3 %v443_v46 }
  0xfd   : > { %1053 = shalt.err (!%p1050_p10)
}
  0xfe   : > { %s1134_s16 = smov 64   ;;  %s1135_s17 = smov 4   ;;  %v919_v47 = vld [vmem:[%s1353_s4] ss:$0 sm:$0xff] }
  0xff   : > { %850 = dma.vmem_to_hbm [thread:$0]  (%p1245_p3), %s554_s11, 256, %s556_s12, %s536_s30, %s1134_s16, %s1134_s16, %s1135_s17  }
 0x100   : > { %s711_s20 = sshll.u32 %s1278_s9, 5  ;;  %s812_s13 = sshll.u32 %s1194_s25, 5 }
 0x101   : > { %s315_s0 = scalar_lea.vmem [#allocation9], %s711_s20  ;;  %s569_s12 = scalar_lea.hbm %s1355_s6, %s812_s13 }
 0x102   : > { %s570_s30 = sshll.u32 %s315_s0, 4  ;;  %s572_s15 = sshll.u32 %s569_s12, 4  ;;  %s571_s30 = int_to_ptr.vmem [resolvable:$true] %s570_s30  ;;  %s573_s15 = int_to_ptr.hbm [resolvable:$true] %s572_s15 }
 0x103   : > { %s541_s7 = scalar_lea.sflag [#allocation10], %s1278_s9  ;;  %s1068_s27 = sshra.s32 %s573_s15, 4  ;;  %s1069_s27 = int_to_ptr.hbm [resolvable:$true] %s1068_s27 }
 0x104   : > { %s1070_s8 = scalar_lea.hbm %s1069_s27, 32  ;;  %s1074_s17 = scalar_lea.hbm %s1355_s6, 64 }
 0x105   : > { %p1071_p12 = scmp.ne.s32.totalorder %s1069_s27, %s1070_s8  ;;  %p1075_p5 = scmp.lt.s32.totalorder %s1069_s27, %s1355_s6 }
 0x106   : > { %p1076_p7 = scmp.lt.s32.totalorder %s1074_s17, %s1070_s8 }
 0x107   : > { %p1072_p13 = pnand %p1071_p12, %p1245_p3 }
 0x108   : > { %p1077_p1 = por %p1076_p7, %p1075_p5 }
 0x109   : > { %p1073_p0 = pneg %p1072_p13 }
 0x10b   : > { %p1078_p4 = pnand %p1077_p1, %p1073_p0 }
 0x173   : > { %v521_v48 = vpop.f32.mrf.mxu1 }
 0x174   : > { %v522_v49 = vadd.f32 %v919_v47, %v521_v48 }
 0x176   : > { %531 = vst [vmem:[%s315_s0] sm:$0xff] %v522_v49 }
 0x17b   : > { %v523_v50 = vpop.f32.mrf.mxu1 }
 0x17c   : > { %v524_v51 = vadd.f32 %v919_v47, %v523_v50 }
 0x17e   : > { %532 = vst [vmem:[%s315_s0 + $0x8] sm:$0xff] %v524_v51 }
 0x17f   : > { %v526_v52 = vpop.f32.mrf.mxu3 }
 0x180   : > { %v527_v53 = vadd.f32 %v919_v47, %v526_v52 }
 0x182   : > { %533 = vst [vmem:[%s315_s0 + $0x10] sm:$0xff] %v527_v53 }
 0x187   : > { %v528_v54 = vpop.f32.mrf.mxu3 }
 0x188   : > { %v529_v55 = vadd.f32 %v919_v47, %v528_v54 }
 0x18a   : > { %534 = vst [vmem:[%s315_s0 + $0x18] sm:$0xff] %v529_v55 }
 0x18b   : > { %1081 = shalt.err (!%p1078_p4)
}
 0x18c   : > { %s1136_s9 = smov 128   ;;  %s1137_s10 = smov 8  }
 0x18d   : > { %851 = dma.vmem_to_hbm [thread:$0]  (%p1245_p3), %s571_s30, 512, %s573_s15, %s541_s7, %s1136_s9, %s1136_s9, %s1137_s10  }
 0x18e PF: > { %s587_s0 = sand.u32 1, %s1116_s21   ;;  %p1367_p8 = scmp.ge.s32.totalorder %s1128_s24, 2 }
 0x18f   : > { %s588_s13 = scalar_lea.sflag [#allocation4], %s587_s0 }
 0x190   : > { %p866_p11 = pnand %p1367_p8, %p1208_p6 }
 0x192   : > { %p867_p2 = pneg %p866_p11 }
 0x194   : > { %1107 = dma.done.wait (%p867_p2), %s588_s13, 256  }
 0x195   : > { %1109 = vsyncadd (%p867_p2), %s588_s13, 4294967040  ;;  %s598_s14 = scalar_lea.sflag [#allocation10], %s587_s0 }
 0x196   : > { %1111 = dma.done.wait (%p867_p2), %s598_s14, 512  }
 0x197   : > { %1113 = vsyncadd (%p867_p2), %s598_s14, 4294966784  ;;  %p24_p3 = scmp.ge.s32.totalorder %s1235_s18, 4   ;;  %s1368_s21 = smov %s1120_s22 }
 0x198   : > { %s1369_s22 = smov %s1124_s23  ;;  %s1370_s23 = smov %s1251_s29 }
 0x199   : > { %s1371_s24 = smov %s1235_s18  ;;  %26 = sbr.rel (!%p24_p3) target bundleno = 10 (0xa), region = 110 }
 0x19e   :  { %604 = vsyncpa [#allocation3], 1 }
 0x19f   :  { %606 = vsyncpa [#allocation3 + $0x1], 1 }
 0x1a0   :  { %607 = vsyncpa [#allocation6], 1 }
 0x1a1   :  { %608 = vsyncpa [#allocation4], 1 }
 0x1a2   :  { %610 = vsyncpa [#allocation4 + $0x1], 1 }
 0x1a3   :  { %611 = vsyncpa [#allocation10], 1 }
 0x1a4   :  { %613 = vsyncpa [#allocation10 + $0x1], 1 }

</bundles_post_ra>
